<compile_context>
chip_gen: v7x
topology: tpu7x:2x2x1
jax: 0.10.0
libtpu: 0.0.40
codegen_flags: <defaults>
</compile_context>

<pallas_src>
import functools
import math

import jax
import jax.numpy as jnp
from jax.experimental import pallas as pl
from jax.experimental.pallas import tpu as pltpu

# Fits under v7x's 64 MiB physical VMEM while raising the 16/32 MiB scoped default.
_VMEM_LIMIT_BYTES = 48 * 1024 * 1024


# ----------------------------------------------------------------------------- kernels
def qkv_proj_kernel(x_ref, w_ref, b_ref, q_ref, k_ref, v_ref, *, scale, compute_dtype):
    """x block (1,TQ,C) @ W_qkv (C,3C) + b -> q,k,v blocks (1,TQ,C); scale folded into q."""
    C = x_ref.shape[2]
    x = x_ref[0].astype(compute_dtype)                         # (TQ, C)
    qkv = jnp.dot(x, w_ref[...], preferred_element_type=jnp.float32) + b_ref[...]
    # Fold 1/sqrt(hd) into Q once (a (TQ,C) multiply) instead of scaling every score tile.
    q_ref[0] = (qkv[:, :C] * scale).astype(q_ref.dtype)
    k_ref[0] = qkv[:, C:2 * C].astype(k_ref.dtype)
    v_ref[0] = qkv[:, 2 * C:].astype(v_ref.dtype)
    # TODO(synk): for large C, tile W_qkv over (TK, TN) with an accumulator instead of
    # keeping the full (C, 3C) weight VMEM-resident.


def flash_attn_kernel(q_ref, k_ref, v_ref, o_ref, m_sc, l_sc, acc_sc, *, compute_dtype):
    """Causal multi-head attention with online softmax.

    Blocks: q (1,H,TQ,hd), k/v (1,H,TK,hd), o (1,H,TQ,hd).
    Scratch (persist across the KV grid axis): m,l (H,TQ,1) f32, acc (H,TQ,hd) f32.
    """
    qi = pl.program_id(1)
    ki = pl.program_id(2)
    TQ = q_ref.shape[2]
    TK = k_ref.shape[2]

    @pl.when(ki == 0)
    def _init():
        m_sc[...] = jnp.full_like(m_sc, -jnp.inf)
        l_sc[...] = jnp.zeros_like(l_sc)
        acc_sc[...] = jnp.zeros_like(acc_sc)

    q_start = qi * TQ
    k_start = ki * TK

    # Skip KV tiles entirely above the causal diagonal (~2x compute saving).
    @pl.when(k_start < q_start + TQ)
    def _compute():
        q = q_ref[0]                                           # (H,TQ,hd), scale pre-folded
        k = k_ref[0]
        v = v_ref[0]
        # Batched over heads; contracts trailing hd of both (no explicit transpose).
        s = jnp.einsum("hqd,hkd->hqk", q, k,
                       preferred_element_type=jnp.float32)     # (H,TQ,TK) f32
        # Per-tile causal mask (only changes anything on diagonal-straddling tiles).
        row = q_start + jax.lax.broadcasted_iota(jnp.int32, (TQ, TK), 0)
        col = k_start + jax.lax.broadcasted_iota(jnp.int32, (TQ, TK), 1)
        s = jnp.where((col <= row)[None, :, :], s, jnp.float32(-1e30))

        m_prev = m_sc[...]                                     # (H,TQ,1)
        m_new = jnp.maximum(m_prev, jnp.max(s, axis=-1, keepdims=True))
        alpha = jnp.exp(m_prev - m_new)
        p = jnp.exp(s - m_new)                                 # (H,TQ,TK) f32
        l_sc[...] = alpha * l_sc[...] + jnp.sum(p, axis=-1, keepdims=True)
        acc_sc[...] = alpha * acc_sc[...] + jnp.einsum(
            "hqk,hkd->hqd", p.astype(compute_dtype), v,
            preferred_element_type=jnp.float32)
        m_sc[...] = m_new

    @pl.when(ki == pl.num_programs(2) - 1)
    def _finalize():
        # Deferred normalization; EUP reciprocal (approx on the bf16 path).
        approx = jnp.dtype(compute_dtype) != jnp.dtype(jnp.float32)
        inv_l = pl.reciprocal(l_sc[...], approx=approx)
        o_ref[0] = (acc_sc[...] * inv_l).astype(o_ref.dtype)


def linear_kernel(x_ref, w_ref, b_ref, o_ref, *, compute_dtype):
    """Output projection: x block (1,TQ,C) @ W (C,C) + b."""
    x = x_ref[0].astype(compute_dtype)
    y = jnp.dot(x, w_ref[...], preferred_element_type=jnp.float32) + b_ref[...]
    o_ref[0] = y.astype(o_ref.dtype)
    # TODO(synk): dropout is identity here (eval-mode semantics); training-mode dropout
    # would use pltpu.prng_seed + pltpu.prng_random_bits for the mask.


# ----------------------------------------------------------------------------- wrapper
def attention_forward(x, wqkv_t, bqkv, wout_t, bout, n_heads, *,
                      compute_dtype=jnp.bfloat16, q_tile=128, k_tile=128):
    B, T, C = x.shape
    hd = C // n_heads
    assert C % n_heads == 0
    tq = min(q_tile, T)
    tk = min(k_tile, T)
    assert T % tq == 0 and T % tk == 0, "sequence length must be divisible by tile sizes"
    scale = 1.0 / math.sqrt(hd)
    cd = jnp.dtype(compute_dtype)

    # Weights stored/DMA'd in the compute dtype (halves weight bytes on the bf16 path);
    # biases stay f32 and are added after f32 accumulation.
    wqkv_c = wqkv_t.astype(cd)
    wout_c = wout_t.astype(cd)
    bqkv_f = bqkv.astype(jnp.float32)
    bout_f = bout.astype(jnp.float32)

    # ---- 1) fused QKV projection (q pre-scaled by 1/sqrt(hd)) -------------------------
    q, k, v = pl.pallas_call(
        functools.partial(qkv_proj_kernel, scale=scale, compute_dtype=cd),
        out_shape=tuple(jax.ShapeDtypeStruct((B, T, C), cd) for _ in range(3)),
        grid_spec=pltpu.PrefetchScalarGridSpec(
            num_scalar_prefetch=0,
            grid=(B, T // tq),
            in_specs=[
                pl.BlockSpec((1, tq, C), lambda b, i: (b, i, 0)),        # x
                pl.BlockSpec((C, 3 * C), lambda b, i: (0, 0)),           # W_qkv^T
                pl.BlockSpec((1, 3 * C), lambda b, i: (0, 0)),           # b_qkv
            ],
            out_specs=[pl.BlockSpec((1, tq, C), lambda b, i: (b, i, 0)) for _ in range(3)],
        ),
        compiler_params=pltpu.CompilerParams(
            dimension_semantics=("parallel", "parallel"),
            vmem_limit_bytes=_VMEM_LIMIT_BYTES),
    )(x, wqkv_c, bqkv_f)

    # Layout plumbing in the wrapper (XLA): (B,T,C) -> (B,H,T,hd)
    def to_heads(a):
        return a.reshape(B, T, n_heads, hd).transpose(0, 2, 1, 3)
    qh, kh, vh = to_heads(q), to_heads(k), to_heads(v)

    # ---- 2) flash-style causal attention ----------------------------------------------
    y = pl.pallas_call(
        functools.partial(flash_attn_kernel, compute_dtype=cd),
        out_shape=jax.ShapeDtypeStruct((B, n_heads, T, hd), cd),
        grid_spec=pltpu.PrefetchScalarGridSpec(
            num_scalar_prefetch=0,
            grid=(B, T // tq, T // tk),
            in_specs=[
                pl.BlockSpec((1, n_heads, tq, hd), lambda b, i, j: (b, 0, i, 0)),  # q
                pl.BlockSpec((1, n_heads, tk, hd), lambda b, i, j: (b, 0, j, 0)),  # k
                pl.BlockSpec((1, n_heads, tk, hd), lambda b, i, j: (b, 0, j, 0)),  # v
            ],
            out_specs=pl.BlockSpec((1, n_heads, tq, hd), lambda b, i, j: (b, 0, i, 0)),
            scratch_shapes=[
                pltpu.VMEM((n_heads, tq, 1), jnp.float32),   # running max
                pltpu.VMEM((n_heads, tq, 1), jnp.float32),   # running denom
                pltpu.VMEM((n_heads, tq, hd), jnp.float32),  # accumulator
            ]),
        compiler_params=pltpu.CompilerParams(
            dimension_semantics=("parallel", "parallel", "arbitrary"),
            vmem_limit_bytes=_VMEM_LIMIT_BYTES),
    )(qh, kh, vh)

    # Layout plumbing: (B,H,T,hd) -> (B,T,C)
    y = y.transpose(0, 2, 1, 3).reshape(B, T, C)

    # ---- 3) output projection ----------------------------------------------------------
    out = pl.pallas_call(
        functools.partial(linear_kernel, compute_dtype=cd),
        out_shape=jax.ShapeDtypeStruct((B, T, C), x.dtype),
        grid_spec=pltpu.PrefetchScalarGridSpec(
            num_scalar_prefetch=0,
            grid=(B, T // tq),
            in_specs=[
                pl.BlockSpec((1, tq, C), lambda b, i: (b, i, 0)),        # y
                pl.BlockSpec((C, C), lambda b, i: (0, 0)),               # W_out^T
                pl.BlockSpec((1, C), lambda b, i: (0, 0)),               # b_out
            ],
            out_specs=pl.BlockSpec((1, tq, C), lambda b, i: (b, i, 0)),
        ),
        compiler_params=pltpu.CompilerParams(
            dimension_semantics=("parallel", "parallel"),
            vmem_limit_bytes=_VMEM_LIMIT_BYTES),
    )(y, wout_c, bout_f)
    return out


# ----------------------------------------------------------------------------- reference
def reference_forward(x, wqkv_t, bqkv, wout_t, bout, n_heads):
    # Pure-JAX reference reproducing the PyTorch module's forward (eval mode).
    B, T, C = x.shape
    hd = C // n_heads
    qkv = x @ wqkv_t + bqkv[0]
    q, k, v = jnp.split(qkv, 3, axis=-1)

    def heads(a):  # (B,T,C) -> (B,H,T,hd)
        return a.reshape(B, T, n_heads, hd).transpose(0, 2, 1, 3)

    q, k, v = heads(q), heads(k), heads(v)
    scores = jnp.einsum("bhqd,bhkd->bhqk", q, k) / math.sqrt(hd)
    mask = jnp.tril(jnp.ones((T, T), bool))
    scores = jnp.where(mask, scores, -1e30)
    p = jax.nn.softmax(scores, axis=-1)
    y = jnp.einsum("bhqk,bhkd->bhqd", p, v)
    y = y.transpose(0, 2, 1, 3).reshape(B, T, C)
    return y @ wout_t + bout[0]


if __name__ == "__main__":
    # Small shapes consistent with the module: B=2, T=8, C=32, 4 heads (hd=8).
    # NOTE: for production shapes pick hd a multiple of 128 and T tiles multiples of 8/16.
    B, T, C, n_heads = 2, 8, 32, 4
    key = jax.random.PRNGKey(0)
    kx, k1, k2, k3, k4 = jax.random.split(key, 5)

    x = jax.random.normal(kx, (B, T, C), dtype=jnp.float32)

    # nn.Linear(C, 3C, bias=True): weight (3C, C), bias (3C,). Passed transposed.
    wqkv = jax.random.normal(k1, (3 * C, C), dtype=jnp.float32) * (1.0 / math.sqrt(C))
    bqkv = jax.random.normal(k2, (3 * C,), dtype=jnp.float32) * 0.02
    # nn.Linear(C, C): weight (C, C), bias (C,).
    wout = jax.random.normal(k3, (C, C), dtype=jnp.float32) * (1.0 / math.sqrt(C))
    bout = jax.random.normal(k4, (C,), dtype=jnp.float32) * 0.02

    wqkv_t = wqkv.T                      # (C, 3C)
    bqkv_2d = bqkv.reshape(1, 3 * C)     # keep biases 2-D for TPU layout
    wout_t = wout.T                      # (C, C)
    bout_2d = bout.reshape(1, C)

    y_ref = reference_forward(x, wqkv_t, bqkv_2d, wout_t, bout_2d, n_heads)

    # f32 compute path: tight correctness check.
    y32 = attention_forward(x, wqkv_t, bqkv_2d, wout_t, bout_2d, n_heads,
                            compute_dtype=jnp.float32)
    y32 = jax.block_until_ready(y32)
    assert jnp.allclose(y32, y_ref, atol=1e-4, rtol=1e-4), "f32 path mismatch vs reference"

    # bf16 MXU path (production default): f32 accumulation, looser tolerance.
    ybf = attention_forward(x, wqkv_t, bqkv_2d, wout_t, bout_2d, n_heads,
                            compute_dtype=jnp.bfloat16)
    ybf = jax.block_until_ready(ybf)
    assert jnp.allclose(ybf, y_ref, atol=1e-1, rtol=1e-1), "bf16 path mismatch vs reference"

    print("KERNEL_OK")
</pallas_src>

<mosaic_0001>
module attributes {stable_mosaic.version = 11 : i64} {
  func.func @qkv_proj_kernel(%arg0: i32, %arg1: i32, %arg2: memref<1x8x32xf32, #tpu.memory_space<vmem>>, %arg3: memref<32x96xf32, #tpu.memory_space<vmem>>, %arg4: memref<1x96xf32, #tpu.memory_space<vmem>>, %arg5: memref<1x8x32xf32, #tpu.memory_space<vmem>>, %arg6: memref<1x8x32xf32, #tpu.memory_space<vmem>>, %arg7: memref<1x8x32xf32, #tpu.memory_space<vmem>>) attributes {dimension_semantics = [#tpu.dimension_semantics<parallel>, #tpu.dimension_semantics<parallel>], iteration_bounds = array<i64: 2, 1>, scalar_prefetch = 0 : i64, scratch_operands = 0 : i64, tpu.core_type = #tpu.core_type<tc>, window_params = [{transform_indices = @transform_0, window_bounds = array<i64: 1, 8, 32>}, {pipeline_mode = #tpu.pipeline_mode<synchronous>, transform_indices = @transform_1, window_bounds = array<i64: 32, 96>}, {pipeline_mode = #tpu.pipeline_mode<synchronous>, transform_indices = @transform_2, window_bounds = array<i64: 1, 96>}, {transform_indices = @transform_3, window_bounds = array<i64: 1, 8, 32>}, {transform_indices = @transform_4, window_bounds = array<i64: 1, 8, 32>}, {transform_indices = @transform_5, window_bounds = array<i64: 1, 8, 32>}]} {
    %c0 = arith.constant 0 : index
    %c0_0 = arith.constant 0 : index
    %c0_1 = arith.constant 0 : index
    %0 = vector.load %arg2[%c0, %c0_0, %c0_1] : memref<1x8x32xf32, #tpu.memory_space<vmem>>, vector<1x8x32xf32>
    %1 = vector.shape_cast %0 : vector<1x8x32xf32> to vector<8x32xf32>
    %c0_2 = arith.constant 0 : index
    %c0_3 = arith.constant 0 : index
    %2 = vector.load %arg3[%c0_2, %c0_3] : memref<32x96xf32, #tpu.memory_space<vmem>>, vector<32x96xf32>
    %cst = arith.constant dense<0.000000e+00> : vector<8x96xf32>
    %3 = tpu.matmul %1, %2, %cst {dimension_numbers = #tpu.dot_dimension_numbers<[1], [0], [0], [1], [0, 0, 1, 1], [], []>} : vector<8x32xf32>, vector<32x96xf32>, vector<8x96xf32> -> vector<8x96xf32>
    %c0_4 = arith.constant 0 : index
    %c0_5 = arith.constant 0 : index
    %4 = vector.load %arg4[%c0_4, %c0_5] : memref<1x96xf32, #tpu.memory_space<vmem>>, vector<1x96xf32>
    %5 = vector.broadcast %4 : vector<1x96xf32> to vector<8x96xf32>
    %6 = arith.addf %3, %5 : vector<8x96xf32>
    %7 = vector.extract_strided_slice %6 {offsets = [0, 0], sizes = [8, 32], strides = [1, 1]} : vector<8x96xf32> to vector<8x32xf32>
    %cst_6 = arith.constant 0.353553385 : f32
    %8 = vector.broadcast %cst_6 : f32 to vector<8x32xf32>
    %9 = arith.mulf %7, %8 : vector<8x32xf32>
    %c0_7 = arith.constant 0 : index
    %c0_8 = arith.constant 0 : index
    %c0_9 = arith.constant 0 : index
    %10 = vector.load %arg5[%c0_7, %c0_8, %c0_9] : memref<1x8x32xf32, #tpu.memory_space<vmem>>, vector<1x8x32xf32>
    %11 = vector.shape_cast %10 : vector<1x8x32xf32> to vector<8x32xf32>
    %12 = vector.shape_cast %9 : vector<8x32xf32> to vector<1x8x32xf32>
    tpu.vector_store %arg5[%c0_7, %c0_8, %c0_9], %12 {strides = array<i32>} : memref<1x8x32xf32, #tpu.memory_space<vmem>>, vector<1x8x32xf32>,
    %13 = vector.extract_strided_slice %6 {offsets = [0, 32], sizes = [8, 32], strides = [1, 1]} : vector<8x96xf32> to vector<8x32xf32>
    %c0_10 = arith.constant 0 : index
    %c0_11 = arith.constant 0 : index
    %c0_12 = arith.constant 0 : index
    %14 = vector.load %arg6[%c0_10, %c0_11, %c0_12] : memref<1x8x32xf32, #tpu.memory_space<vmem>>, vector<1x8x32xf32>
    %15 = vector.shape_cast %14 : vector<1x8x32xf32> to vector<8x32xf32>
    %16 = vector.shape_cast %13 : vector<8x32xf32> to vector<1x8x32xf32>
    tpu.vector_store %arg6[%c0_10, %c0_11, %c0_12], %16 {strides = array<i32>} : memref<1x8x32xf32, #tpu.memory_space<vmem>>, vector<1x8x32xf32>,
    %17 = vector.extract_strided_slice %6 {offsets = [0, 64], sizes = [8, 32], strides = [1, 1]} : vector<8x96xf32> to vector<8x32xf32>
    %c0_13 = arith.constant 0 : index
    %c0_14 = arith.constant 0 : index
    %c0_15 = arith.constant 0 : index
    %18 = vector.load %arg7[%c0_13, %c0_14, %c0_15] : memref<1x8x32xf32, #tpu.memory_space<vmem>>, vector<1x8x32xf32>
    %19 = vector.shape_cast %18 : vector<1x8x32xf32> to vector<8x32xf32>
    %20 = vector.shape_cast %17 : vector<8x32xf32> to vector<1x8x32xf32>
    tpu.vector_store %arg7[%c0_13, %c0_14, %c0_15], %20 {strides = array<i32>} : memref<1x8x32xf32, #tpu.memory_space<vmem>>, vector<1x8x32xf32>,
    return
  }
  func.func @transform_0(%arg0: i32, %arg1: i32) -> (i32, i32, i32) {
    %c0_i32 = arith.constant 0 : i32
    %c0_i32_0 = arith.constant 0 : i32
    return %arg0, %arg1, %c0_i32 : i32, i32, i32
  }
  func.func @transform_1(%arg0: i32, %arg1: i32) -> (i32, i32) {
    %c0_i32 = arith.constant 0 : i32
    %c0_i32_0 = arith.constant 0 : i32
    %c0_i32_1 = arith.constant 0 : i32
    return %c0_i32, %c0_i32_0 : i32, i32
  }
  func.func @transform_2(%arg0: i32, %arg1: i32) -> (i32, i32) {
    %c0_i32 = arith.constant 0 : i32
    %c0_i32_0 = arith.constant 0 : i32
    %c0_i32_1 = arith.constant 0 : i32
    return %c0_i32, %c0_i32_0 : i32, i32
  }
  func.func @transform_3(%arg0: i32, %arg1: i32) -> (i32, i32, i32) {
    %c0_i32 = arith.constant 0 : i32
    %c0_i32_0 = arith.constant 0 : i32
    return %arg0, %arg1, %c0_i32 : i32, i32, i32
  }
  func.func @transform_4(%arg0: i32, %arg1: i32) -> (i32, i32, i32) {
    %c0_i32 = arith.constant 0 : i32
    %c0_i32_0 = arith.constant 0 : i32
    return %arg0, %arg1, %c0_i32 : i32, i32, i32
  }
  func.func @transform_5(%arg0: i32, %arg1: i32) -> (i32, i32, i32) {
    %c0_i32 = arith.constant 0 : i32
    %c0_i32_0 = arith.constant 0 : i32
    return %arg0, %arg1, %c0_i32 : i32, i32, i32
  }
}

</mosaic_0001>

<bundles_post_ra>
// kernel: tpu_custom_call.1
= control target key start
LH: loop header
LB: loop body
LE: loop exit
PB: predicated region body
PF: predicated region fallthrough
CT: control target
= control target key end

     0   :  { %11 = vsyncpa [#allocation3], 0  ;;  %s1280_s0 = inlined_call_operand.hbm [shape: f32[2,8,32], index: 0, kind: input, shape index: {}]   ;;  %s1281_s1 = inlined_call_operand.hbm [shape: f32[32,96], index: 1, kind: input, shape index: {}]   ;;  %s1282_s2 = inlined_call_operand.vmem [shape: f32[1,96], index: 2, kind: input, shape index: {}]   ;;  %s1283_s3 = inlined_call_operand.hbm [shape: f32[2,8,32], index: 3, kind: output, shape index: {0}]   ;;  %s1284_s4 = inlined_call_operand.hbm [shape: f32[2,8,32], index: 4, kind: output, shape index: {1}]   ;;  %s1285_s5 = inlined_call_operand.hbm [shape: f32[2,8,32], index: 5, kind: output, shape index: {2}]  }
   0x1   :  { %13 = vsyncpa [#allocation3 + $0x1], 0 }
   0x2   :  { %14 = vsyncpa [#allocation6], 0 }
   0x3   :  { %15 = vsyncpa [#allocation4], 0 }
   0x4   :  { %17 = vsyncpa [#allocation4 + $0x1], 0 }
   0x5   :  { %18 = vsyncpa [#allocation9], 0 }
   0x6   :  { %20 = vsyncpa [#allocation9 + $0x1], 0  ;;  %s980_s18 = smov 0   ;;  %s982_s19 = smov 0  }
   0x7   :  { %s984_s20 = smov 0   ;;  %s986_s21 = smov 0  }
   0x8   :  { %s988_s22 = smov 0   ;;  %s990_s23 = smov 0  }
   0x9 LB: > { %s1011_s24 = sadd.s32 4294967295, %s936_s23   ;;  %s1289_s25 = sadd.s32 4294967294, %s936_s23   ;;  %s936_s23 = sphi %s990_s23, %s26_s23   ;;  %s932_s22 = sphi %s988_s22, %s1309_s22   ;;  %s928_s21 = sphi %s986_s21, %s1308_s21   ;;  %s924_s20 = sphi %s984_s20, %s1307_s20   ;;  %s920_s19 = sphi %s982_s19, %s1306_s19   ;;  %s916_s18 = sphi %s980_s18, %s1305_s18  }
   0xa   : > { %p60_p0 = scmp.ne.s32.totalorder %s920_s19, %s916_s18  ;;  %p1286_p1 = scmp.eq.s32.totalorder %s1011_s24, 0 }
   0xb   : > { %p134_p3 = scmp.eq.s32.totalorder %s1289_s25, 1  ;;  %p599_p5 = scmp.ge.s32.totalorder %s936_s23, 1 }
   0xc   : > { %p1022_p4 = por %p1286_p1, %p60_p0  ;;  %p197_p7 = scmp.lt.s32.totalorder %s936_s23, 3 }
   0xd   : > { %p1027_p6 = por %p134_p3, %p60_p0  ;;  %s938_s29 = smov [#allocation5]  }
   0xe   : > { %s1290_s26 = scalar_select %p1022_p4, 1, 0 }
   0xf   : > { %s1291_s27 = scalar_select %p1027_p6, 1, 0 }
  0x10   : > { %p1032_p8 = pnand %p599_p5, %p197_p7  ;;  %s209_s30 = sshll.u32 %s938_s29, 4  ;;  %s210_s30 = int_to_ptr.vmem [resolvable:$true] %s209_s30 }
  0x11   : > { %s38_s7 = sadd.s32 1, %s932_s22  ;;  %s732_s10 = scalar_lea.hbm %s1281_s1, 512 }
  0x12   : > { %s1292_s28 = scalar_select %p1032_p8, 1, 0 }
  0x13   : > { %p654_p9 = pneg %p1032_p8  ;;  %p733_p12 = scmp.ne.s32.totalorder %s1281_s1, %s732_s10 }
  0x14   : > { %p739_p5 = scmp.lt.u32.totalorder %s732_s10, %s1281_s1 }
  0x15   : > { %p1041_p11 = pnand %p654_p9, %p1286_p1 }
  0x17   : > { %p734_p13 = pneg %p1041_p11 }
  0x19   : > { %p735_p0 = pnand %p734_p13, %p733_p12 }
  0x1b   : > { %p736_p3 = pneg %p735_p0 }
  0x1d   : > { %p741_p7 = pnand %p739_p5, %p736_p3 }
  0x1f   : > { %744 = shalt.err (!%p741_p7)
}
  0x20   : > { %s745_s15 = scalar_lea.vmem %s210_s30, 512  ;;  %p753_p2 = scmp.lt.s32.totalorder %s210_s30, %s210_s30 }
  0x21   : > { %p746_p9 = scmp.ne.s32.totalorder %s210_s30, %s745_s15  ;;  %p754_p6 = scmp.lt.s32.totalorder %s745_s15, %s745_s15 }
  0x23   : > { %p748_p10 = pnand %p746_p9, %p734_p13  ;;  %p755_p4 = por %p754_p6, %p753_p2 }
  0x25   : > { %p749_p1 = pneg %p748_p10 }
  0x27   : > { %p756_p8 = pnand %p755_p4, %p749_p1 }
  0x29   : > { %759 = shalt.err (!%p756_p8)
}
  0x2a   : > { %s939_s16 = smov 128   ;;  %s940_s17 = smov 8  }
  0x2b   : > { %657 = dma.hbm_to_vmem [thread:$0]  (!%p1041_p11), %s1281_s1, 512, %s210_s30, [#allocation6], %s939_s16, %s939_s16, %s940_s17  }
  0x2c   : > { %p40_p1 = scmp.ge.s32.totalorder %s38_s7, 2  ;;  %s47_s9 = sadd.s32 1, %s924_s20 }
  0x2d   : > { %p54_p2 = scmp.ne.s32.totalorder %s924_s20, %s920_s19  ;;  %p55_p4 = scmp.eq.s32.totalorder %s936_s23, 0 }
  0x2e   : > { %s1311_s7 = smov (%p40_p1, %s38_s7), 0  ;;  %p1295_p8 = scmp.eq.s32.totalorder %s1011_s24, 1 }
  0x2f   : > { %p1068_p6 = por %p55_p4, %p54_p2  ;;  %s42_s6 = ssub.s32 %s932_s22, %s1311_s7 }
  0x30   : > { %p1074_p10 = por %p1295_p8, %p54_p2  ;;  %p673_p12 = scmp.lt.s32.totalorder %s936_s23, 2 }
  0x31   : > { %p45_p11 = scmp.eq.s32.totalorder %s42_s6, 0  ;;  %s226_s30 = sand.u32 1, %s924_s20  }
  0x32   : > { %s602_s12 = sshll.u32 %s226_s30, 3  ;;  %s603_s14 = sshll.u32 %s932_s22, 7 }
  0x33   : > { %s1083_s13 = scalar_select %p45_p11, %s924_s20, %s47_s9  }
  0x34   : > { %s1089_s17 = scalar_lea.hbm %s1280_s0, %s603_s14  ;;  %s230_s29 = scalar_lea.vmem [#allocation2], %s602_s12 }
  0x35   : > { %s238_s8 = sshll.u32 %s230_s29, 4  ;;  %p1095_p13 = pnand %p673_p12, %p1068_p6  ;;  %s1091_s8 = int_to_ptr.vmem [resolvable:$true] %s238_s8 }
  0x36   : > { %s227_s9 = scalar_lea.sflag [#allocation3], %s226_s30  ;;  %s760_s25 = scalar_lea.hbm %s1089_s17, 128 }
  0x37   : > { %p761_p0 = scmp.ne.s32.totalorder %s1089_s17, %s760_s25  ;;  %p762_p3 = pneg %p1095_p13 }
  0x38   : > { %s765_s15 = scalar_lea.hbm %s1280_s0, 256  ;;  %p766_p9 = scmp.lt.u32.totalorder %s1089_s17, %s1280_s0 }
  0x39   : > { %p763_p5 = pnand %p762_p3, %p761_p0  ;;  %p767_p1 = scmp.lt.u32.totalorder %s765_s15, %s760_s25 }
  0x3a   : > { %p769_p4 = scmp.lt.u32.totalorder %s760_s25, %s1089_s17 }
  0x3b   : > { %p764_p7 = pneg %p763_p5  ;;  %p768_p2 = por %p767_p1, %p766_p9 }
  0x3d   : > { %p770_p6 = por %p769_p4, %p768_p2 }
  0x3f   : > { %p771_p8 = pnand %p770_p6, %p764_p7 }
  0x41   : > { %774 = shalt.err (!%p771_p8)
}
  0x42   : > { %s775_s30 = scalar_lea.vmem %s1091_s8, 128  ;;  %s941_s29 = smov [#allocation2]  }
  0x43   : > { %p776_p12 = scmp.ne.s32.totalorder %s1091_s8, %s775_s30  ;;  %s780_s12 = sshll.u32 %s941_s29, 4  ;;  %s781_s12 = int_to_ptr.vmem [resolvable:$false] %s780_s12 }
  0x44   : > { %s782_s14 = scalar_lea.vmem %s781_s12, 256  ;;  %p783_p5 = scmp.lt.s32.totalorder %s1091_s8, %s781_s12 }
  0x45   : > { %p778_p11 = pnand %p776_p12, %p762_p3  ;;  %p784_p9 = scmp.lt.s32.totalorder %s782_s14, %s775_s30 }
  0x47   : > { %p779_p0 = pneg %p778_p11  ;;  %p785_p1 = por %p784_p9, %p783_p5 }
  0x49   : > { %p786_p2 = pnand %p785_p1, %p779_p0 }
  0x4b   : > { %789 = shalt.err (!%p786_p2)
}
  0x4c   : > { %661 = dma.hbm_to_vmem [thread:$0]  (!%p1095_p13), %s1089_s17, 128, %s1091_s8, %s227_s9  }
  0x4d   : > { %p1298_p7 = scmp.ne.s32.totalorder %s1292_s28, 0 }
  0x4e   : > { %s1127_s25 = sand.u32 (!%p1298_p7), 1, %s920_s19   ;;  %p1299_p3 = scmp.ne.s32.totalorder (!%p1298_p7), %s1290_s26, 0 }
  0x4f   : > { %247 = sbr.rel (%p1298_p7) target bundleno = 466 (0x1d2), region = 32  ;;  %s1130_s15 = sshll.u32 (!%p1298_p7), %s1127_s25, 3 }
  0x50   : > { %s250_s10 = scalar_lea.sflag (!%p1298_p7), [#allocation3], %s1127_s25  ;;  %s253_s16 = scalar_lea.vmem (!%p1298_p7), [#allocation2], %s1130_s15 }
  0x56   : > { %899 = dma.done.wait (%p1299_p3), %s250_s10, 128  }
  0x57   : > { %901 = vsyncadd (%p1299_p3), %s250_s10, 4294967168  ;;  %p1300_p13 = scmp.eq.s32.totalorder %s1011_s24, 0 }
  0x59   : > { %903 = dma.done.wait (%p1300_p13), [#allocation6], 512   ;;  %p1301_p4 = pmov %p1300_p13 }
  0x5a   : > { %v942_v0 = vmov 0.0|0.0   ;;  %vm943_vm0 = vmmov 0   ;;  %v944_v1 = vmov 0.0   ;;  %v295_v2 = vld [vmem:[#allocation5] sm:$0xff]  ;;  %v296_v3 = vld [vmem:[#allocation5 + $0x8] sm:$0xff]  ;;  %v297_v4 = vld [vmem:[#allocation5 + $0x10] sm:$0xff] }
  0x5b   : > { %905 = vsyncadd (%p1301_p4), [#allocation6], 4294966784  ;;  %636 = vmatprep.subr.bf16.mxu0 %v942_v0  ;;  %633 = vmatprep.mubr.msk.f32.mxu0 %vm943_vm0, %v944_v1  ;;  %v637_v5 = vpack.c.bf16 %v296_v3, %v295_v2  ;;  %v298_v6 = vld [vmem:[#allocation5 + $0x18] sm:$0xff]  ;;  %vm306_vm1 = vcmask 261120   ;;  %v610_v9 = vld [vmem:[%s1282_s2] ss:$0 sm:$0xff] }
  0x5c   : > { %v640_v7 = vpack.c.bf16 %v298_v6, %v297_v4  ;;  %v294_v8 = vld [vmem:[%s253_s16] sm:$0xff]  ;;  %s1147_s17 = sshll.u32 %s928_s21, 7  ;;  %s279_s8 = scalar_lea.vmem [#allocation7], %s1130_s15 }
  0x5d   : > { %638 = vmatpush3.bf16.msra.mxu0 %v637_v5  ;;  %s416_s6 = sshll.u32 %s279_s8, 4  ;;  %s945_s9 = smov 96   ;;  %s1156_s6 = int_to_ptr.vmem [resolvable:$true] %s416_s6 }
  0x5e   : > { %639 = vmatprep.subr.bf16.mxu0 %v942_v0  ;;  %s1154_s12 = scalar_lea.hbm %s1283_s3, %s1147_s17  ;;  %s392_s21 = scalar_lea.sflag [#allocation4], %s1127_s25 }
  0x5f   : > { %s790_s14 = scalar_lea.vmem %s1156_s6, 128  ;;  %s946_s10 = smov [#allocation7]  }
  0x60   : > { %p791_p6 = scmp.ne.s32.totalorder %s1156_s6, %s790_s14  ;;  %s794_s16 = sshll.u32 %s946_s10, 4  ;;  %s795_s16 = int_to_ptr.vmem [resolvable:$false] %s794_s16 }
  0x61   : > { %641 = vmatpush3.bf16.msra.mxu0 %v640_v7  ;;  %s796_s26 = scalar_lea.vmem %s795_s16, 256  ;;  %p797_p11 = scmp.lt.s32.totalorder %s1156_s6, %s795_s16 }
  0x62   : > { %p792_p8 = pnand %p791_p6, %p1074_p10  ;;  %p798_p0 = scmp.lt.s32.totalorder %s796_s26, %s790_s14 }
  0x64   : > { %634 = vmatmul.mubr.msk.f32.vlgmr.msra.gmra.mrb[0].mxu0 %vm306_vm1, %v294_v8  ;;  %p793_p12 = pneg %p792_p8  ;;  %p799_p5 = por %p798_p0, %p797_p11 }
  0x66   : > { %p800_p9 = pnand %p799_p5, %p793_p12 }
 0x137   : > { %v376_v10 = vpop.f32.mrb[0].mxu0 }
 0x138   : > { %v377_v11 = vadd.f32 %v610_v9, %v376_v10  ;;  %v635_v12 = vpop.f32.mrb[1].mxu0 }
 0x13a   : > { %v380_v13 = vmul.f32 0.35355338, %v377_v11  ;;  %383 = vrot.lane.b32.xlu0 %v377_v11, %s945_s9 }
 0x13c   : > { %381 = vst.msk [vmem:[%s279_s8] sm:$0xff] %vm306_vm1, %v380_v13 }
 0x13d   : > { %803 = shalt.err (!%p800_p9)
}
 0x13e   : > { %s804_s25 = scalar_lea.hbm %s1154_s12, 128  ;;  %s808_s9 = scalar_lea.hbm %s1283_s3, 256 }
 0x13f   : > { %p805_p1 = scmp.ne.s32.totalorder %s1154_s12, %s804_s25  ;;  %p809_p3 = scmp.lt.u32.totalorder %s1154_s12, %s1283_s3 }
 0x140   : > { %p810_p13 = scmp.lt.u32.totalorder %s808_s9, %s804_s25  ;;  %p812_p6 = scmp.lt.u32.totalorder %s804_s25, %s1154_s12 }
 0x141   : > { %p806_p2 = pnand %p805_p1, %p1074_p10 }
 0x142   : > { %p811_p4 = por %p810_p13, %p809_p3 }
 0x143   : > { %p807_p7 = pneg %p806_p2 }
 0x144   : > { %p813_p8 = por %p812_p6, %p811_p4 }
 0x146   : > { %p814_p12 = pnand %p813_p8, %p807_p7 }
 0x148   : > { %817 = shalt.err (!%p814_p12)
}
 0x149   : > { %648 = dma.vmem_to_hbm [thread:$0]  (%p1074_p10), %s1156_s6, 128, %s1154_s12, %s392_s21  }
 0x14a   : > { %s947_s14 = smov 64   ;;  %s396_s10 = sand.u32 1, %s1011_s24  }
 0x14b   : > { %387 = vrot.lane.b32.xlu0 %v377_v11, %s947_s14  ;;  %s286_s16 = scalar_lea.vmem [#allocation8], %s1130_s15  ;;  %s1187_s8 = scalar_lea.hbm %s1284_s4, %s1147_s17 }
 0x14c   : > { %s430_s26 = sshll.u32 %s286_s16, 4  ;;  %s293_s9 = scalar_lea.vmem [#allocation10], %s1130_s15  ;;  %s1189_s26 = int_to_ptr.vmem [resolvable:$true] %s430_s26 }
 0x14d   : > { %s1194_s30 = sshll.u32 %s293_s9, 4  ;;  %s1197_s24 = scalar_lea.sflag [#allocation9], %s396_s10  ;;  %s1228_s30 = int_to_ptr.vmem [resolvable:$true] %s1194_s30 }
 0x14e   : > { %s818_s6 = scalar_lea.vmem %s1189_s26, 128  ;;  %s948_s12 = smov [#allocation8]  }
 0x14f   : > { %p819_p11 = scmp.ne.s32.totalorder %s1189_s26, %s818_s6  ;;  %s822_s21 = sshll.u32 %s948_s12, 4  ;;  %s823_s21 = int_to_ptr.vmem [resolvable:$false] %s822_s21 }
 0x150   : > { %s824_s29 = scalar_lea.vmem %s823_s21, 256  ;;  %p825_p9 = scmp.lt.s32.totalorder %s1189_s26, %s823_s21 }
 0x151   : > { %p820_p0 = pnand %p819_p11, %p1074_p10  ;;  %p826_p1 = scmp.lt.s32.totalorder %s824_s29, %s818_s6 }
 0x153   : > { %p821_p5 = pneg %p820_p0  ;;  %p827_p2 = por %p826_p1, %p825_p9 }
 0x155   : > { %p828_p7 = pnand %p827_p2, %p821_p5 }
 0x1ac   : > { %v384_v14 = vpop.permute.xlu0 %383 }
 0x1ad   : > { %386 = vst.msk [vmem:[%s286_s16] sm:$0xff] %vm306_vm1, %v384_v14 }
 0x1ae   : > { %831 = shalt.err (!%p828_p7)
}
 0x1af   : > { %s832_s14 = scalar_lea.hbm %s1187_s8, 128  ;;  %s836_s25 = scalar_lea.hbm %s1284_s4, 256 }
 0x1b0   : > { %p833_p3 = scmp.ne.s32.totalorder %s1187_s8, %s832_s14  ;;  %p837_p6 = scmp.lt.u32.totalorder %s1187_s8, %s1284_s4 }
 0x1b1   : > { %p838_p8 = scmp.lt.u32.totalorder %s836_s25, %s832_s14  ;;  %p840_p11 = scmp.lt.u32.totalorder %s832_s14, %s1187_s8 }
 0x1b2   : > { %p834_p13 = pnand %p833_p3, %p1074_p10 }
 0x1b3   : > { %p839_p12 = por %p838_p8, %p837_p6 }
 0x1b4   : > { %p835_p4 = pneg %p834_p13 }
 0x1b5   : > { %p841_p0 = por %p840_p11, %p839_p12 }
 0x1b7   : > { %p842_p5 = pnand %p841_p0, %p835_p4 }
 0x1b9   : > { %845 = shalt.err (!%p842_p5)
}
 0x1ba   : > { %649 = dma.vmem_to_hbm [thread:$0]  (%p1074_p10), %s1189_s26, 128, %s1187_s8, %s1197_s24  }
 0x1bb   : > { %s1225_s29 = scalar_lea.hbm %s1285_s5, %s1147_s17  ;;  %s846_s14 = scalar_lea.vmem %s1228_s30, 128 }
 0x1bc   : > { %p847_p9 = scmp.ne.s32.totalorder %s1228_s30, %s846_s14  ;;  %s949_s26 = smov [#allocation10]  }
 0x1bd   : > { %v388_v15 = vpop.permute.xlu0 %387  ;;  %s850_s8 = sshll.u32 %s949_s26, 4  ;;  %s851_s8 = int_to_ptr.vmem [resolvable:$false] %s850_s8 }
 0x1be   : > { %390 = vst.msk [vmem:[%s293_s9] sm:$0xff] %vm306_vm1, %v388_v15  ;;  %p848_p1 = pnand %p847_p9, %p1074_p10  ;;  %s852_s10 = scalar_lea.vmem %s851_s8, 256 }
 0x1bf   : > { %p853_p7 = scmp.lt.s32.totalorder %s1228_s30, %s851_s8  ;;  %p854_p3 = scmp.lt.s32.totalorder %s852_s10, %s846_s14 }
 0x1c0   : > { %p849_p2 = pneg %p848_p1 }
 0x1c1   : > { %p855_p13 = por %p854_p3, %p853_p7 }
 0x1c3   : > { %p856_p4 = pnand %p855_p13, %p849_p2 }
 0x1c5   : > { %859 = shalt.err (!%p856_p4)
}
 0x1c6   : > { %s860_s15 = scalar_lea.hbm %s1225_s29, 128  ;;  %s864_s16 = scalar_lea.hbm %s1285_s5, 256 }
 0x1c7   : > { %p861_p6 = scmp.ne.s32.totalorder %s1225_s29, %s860_s15  ;;  %p865_p11 = scmp.lt.u32.totalorder %s1225_s29, %s1285_s5 }
 0x1c8   : > { %p866_p0 = scmp.lt.u32.totalorder %s864_s16, %s860_s15  ;;  %p868_p9 = scmp.lt.u32.totalorder %s860_s15, %s1225_s29 }
 0x1c9   : > { %p862_p8 = pnand %p861_p6, %p1074_p10 }
 0x1ca   : > { %p867_p5 = por %p866_p0, %p865_p11 }
 0x1cb   : > { %p863_p12 = pneg %p862_p8 }
 0x1cc   : > { %p869_p1 = por %p868_p9, %p867_p5 }
 0x1ce   : > { %p870_p2 = pnand %p869_p1, %p863_p12 }
 0x1d0   : > { %873 = shalt.err (!%p870_p2)
}
 0x1d1   : > { %650 = dma.vmem_to_hbm [thread:$0]  (%p1074_p10), %s1228_s30, 128, %s1225_s29, %s1197_s24  }
 0x1d2 PF: > { %s456_s12 = sand.u32 1, %s916_s18   ;;  %p1302_p7 = scmp.ne.s32.totalorder %s1291_s27, 0 }
 0x1d3   : > { %p1303_p3 = scmp.ge.s32.totalorder %s936_s23, 2  ;;  %s457_s6 = scalar_lea.sflag [#allocation4], %s456_s12 }
 0x1d5   : > { %p663_p13 = pnand %p1303_p3, %p1302_p7 }
 0x1d7   : > { %907 = dma.done.wait (!%p663_p13), %s457_s6, 128  }
 0x1d8   : > { %909 = vsyncadd (!%p663_p13), %s457_s6, 4294967168  ;;  %s1304_s21 = sadd.s32 4294967294, %s936_s23  }
 0x1d9   : > { %s465_s14 = sand.u32 1, %s1304_s21  }
 0x1da   : > { %s466_s26 = scalar_lea.sflag [#allocation9], %s465_s14 }
 0x1db   : > { %911 = dma.done.wait (!%p663_p13), %s466_s26, 256  }
 0x1dc   : > { %913 = vsyncadd (!%p663_p13), %s466_s26, 4294967040  ;;  %s26_s23 = sadd.s32 1, %s936_s23   ;;  %s1305_s18 = smov %s920_s19 }
 0x1dd   : > { %p23_p10 = scmp.ge.s32.totalorder %s26_s23, 4   ;;  %s1306_s19 = smov %s924_s20 }
 0x1de   : > { %s1307_s20 = smov %s1083_s13  ;;  %s1308_s21 = smov %s932_s22 }
 0x1df   : > { %s1309_s22 = smov %s1311_s7  ;;  %25 = sbr.rel (!%p23_p10) target bundleno = 9 (0x9), region = 113 }
 0x1e6   :  { %480 = vsyncpa [#allocation3], 1 }
 0x1e7   :  { %482 = vsyncpa [#allocation3 + $0x1], 1 }
 0x1e8   :  { %483 = vsyncpa [#allocation6], 1 }
 0x1e9   :  { %484 = vsyncpa [#allocation4], 1 }
 0x1ea   :  { %486 = vsyncpa [#allocation4 + $0x1], 1 }
 0x1eb   :  { %487 = vsyncpa [#allocation9], 1 }
 0x1ec   :  { %489 = vsyncpa [#allocation9 + $0x1], 1 }

</bundles_post_ra>
